<compile_context>
chip_gen: v6e
topology: v6e:2x2x1
jax: 0.10.0
libtpu: 0.0.40
codegen_flags: <defaults>
</compile_context>

<pallas_src>
import functools

import jax
import jax.numpy as jnp
from jax.experimental import pallas as pl
from jax.experimental.pallas import tpu as pltpu

_TARGET_STEPS = 8                  # >=2 steps per v7x core, amortizes ~0.35us/step
_E_MAX_BYTES = 4 * 1024 * 1024     # separable E is tiny; guard absurdly wide maps


def _budgets():
    """(block_budget_bytes, vmem_limit_bytes) — generation aware."""
    try:
        cap = int(pltpu.get_tpu_info().vmem_capacity_bytes)
    except Exception:
        cap = 64 * 1024 * 1024                         # conservative (v7x-sized)
    if cap >= 100 * 1024 * 1024:                       # v5e / v6e: 128 MiB / core
        return 32 * 1024 * 1024, 96 * 1024 * 1024
    return 16 * 1024 * 1024, 40 * 1024 * 1024          # v7x: 64 MiB / core


def _upsample_kernel(x_ref, e_ref, o_ref, *, stride):
    # (tm, W) @ (W, W*s) -> (tm, W*s).  Each column of E is one-hot, so the f32
    # accumulation and the cast back to the output dtype are bit-exact.
    x = x_ref[...].astype(e_ref.dtype)
    y = jnp.dot(x, e_ref[...], preferred_element_type=jnp.float32)
    y = y.astype(o_ref.dtype)
    # H-axis (row) replication: s lane-contiguous copies, one full-width store.
    o_ref[...] = jnp.concatenate([y] * stride, axis=-1)


def _jnp_upsample(x, s):
    B, C, H, W = x.shape
    return jnp.broadcast_to(
        x[:, :, :, None, :, None], (B, C, H, s, W, s)
    ).reshape(B, C, H * s, W * s)


def upsample_nearest(x, stride=2):
    """Pallas TPU equivalent of Upsample(stride).forward(x) for NCHW input."""
    assert x.ndim == 4
    B, C, H, W = x.shape
    s = int(stride)
    if s == 1:
        return x
    Ho, Wo = H * s, W * s
    M = B * C * H

    dt = jnp.dtype(x.dtype)
    if dt == jnp.dtype(jnp.float32) or dt == jnp.dtype(jnp.bfloat16):
        e_dtype = dt                      # 0/1 is exact in the input dtype
    elif dt == jnp.dtype(jnp.float16):
        e_dtype = jnp.dtype(jnp.float32)  # upcast in-kernel; still bit-exact
    else:
        # TODO(synk): dedicated integer / fp8 Pallas path (int8 MXU on v5e/v6e,
        # lane-gather elsewhere); exact XLA broadcast avoids an inexact f32 trip.
        return _jnp_upsample(x, s)

    if W * Wo * e_dtype.itemsize > _E_MAX_BYTES:
        # TODO(synk): tile the W axis (block-diagonal E) for extremely wide maps.
        return _jnp_upsample(x, s)

    # Exact separable expansion matrix: E[w, wo] = 1 iff w == wo // s.
    w_in = jnp.arange(W)
    w_out = jnp.arange(Wo)
    e = (w_in[:, None] == (w_out[None, :] // s)).astype(e_dtype)

    # ---- block-row (M) tile selection ----
    itemsize = dt.itemsize
    sub = max(8, 32 // itemsize)                  # sublane pack: 8 f32, 16 bf16
    bytes_per_row = (W + s * s * W) * itemsize    # in + out, per block row
    block_budget, vmem_limit = _budgets()
    rows_budget = max(sub, ((block_budget // (2 * bytes_per_row)) // sub) * sub)
    rows_for_steps = ((pl.cdiv(M, _TARGET_STEPS) + sub - 1) // sub) * sub
    tm = max(sub, min(rows_budget, rows_for_steps))
    if tm >= M:
        tm = M                                     # single full-extent block
    elif tm >= 256:
        tm = (tm // 128) * 128                     # MXU / layout friendly
    grid = (pl.cdiv(M, tm),)

    xf = x.reshape(M, W)

    out = pl.pallas_call(
        functools.partial(_upsample_kernel, stride=s),
        out_shape=jax.ShapeDtypeStruct((M, s * Wo), x.dtype),
        grid_spec=pltpu.PrefetchScalarGridSpec(
            num_scalar_prefetch=0,
            grid=grid,
            in_specs=[
                pl.BlockSpec((tm, W), lambda i: (i, 0)),
                # Constant index map: the tiny E is DMA'd once, then reused.
                pl.BlockSpec((W, Wo), lambda i: (0, 0)),
            ],
            out_specs=pl.BlockSpec((tm, s * Wo), lambda i: (i, 0)),
        ),
        compiler_params=pltpu.CompilerParams(
            dimension_semantics=("parallel",),
            vmem_limit_bytes=vmem_limit,
        ),
    )(xf, e)

    return out.reshape(B, C, Ho, Wo)


if __name__ == "__main__":
    key = jax.random.PRNGKey(0)
    k0, k1 = jax.random.split(key)

    B, C, H, W, s = 2, 4, 16, 16, 2
    x = jax.random.normal(k0, (B, C, H, W), dtype=jnp.float32)

    y = jax.block_until_ready(upsample_nearest(x, stride=s))
    assert y.shape == (B, C, H * s, W * s), y.shape
    assert jnp.array_equal(y, _jnp_upsample(x, s)), "f32 mismatch vs reference"

    # bf16 path: dtype-matched 0/1 expansion matrix keeps it bit-exact.
    xb = x.astype(jnp.bfloat16)
    yb = jax.block_until_ready(upsample_nearest(xb, stride=s))
    assert jnp.array_equal(yb, _jnp_upsample(xb, s)), "bf16 mismatch vs reference"

    # Odd channel count / non-multiple-of-8 row count exercises the masked
    # final block path (M = 36 rows, tm = 8).
    x2 = jax.random.normal(k1, (1, 3, 12, 16), dtype=jnp.float32)
    y2 = jax.block_until_ready(upsample_nearest(x2, stride=s))
    assert jnp.array_equal(y2, _jnp_upsample(x2, s)), "odd-shape mismatch vs reference"

    print("KERNEL_OK")
</pallas_src>

<mosaic_0001>
module attributes {stable_mosaic.version = 11 : i64} {
  func.func @_upsample_kernel(%arg0: i32, %arg1: memref<16x16xf32, #tpu.memory_space<vmem>>, %arg2: memref<16x32xf32, #tpu.memory_space<vmem>>, %arg3: memref<16x64xf32, #tpu.memory_space<vmem>>) attributes {dimension_semantics = [#tpu.dimension_semantics<parallel>], iteration_bounds = array<i64: 8>, scalar_prefetch = 0 : i64, scratch_operands = 0 : i64, tpu.core_type = #tpu.core_type<tc>, window_params = [{transform_indices = @transform_0, window_bounds = array<i64: 16, 16>}, {pipeline_mode = #tpu.pipeline_mode<synchronous>, transform_indices = @transform_1, window_bounds = array<i64: 16, 32>}, {transform_indices = @transform_2, window_bounds = array<i64: 16, 64>}]} {
    %c0 = arith.constant 0 : index
    %c0_0 = arith.constant 0 : index
    %0 = vector.load %arg1[%c0, %c0_0] : memref<16x16xf32, #tpu.memory_space<vmem>>, vector<16x16xf32>
    %c0_1 = arith.constant 0 : index
    %c0_2 = arith.constant 0 : index
    %1 = vector.load %arg2[%c0_1, %c0_2] : memref<16x32xf32, #tpu.memory_space<vmem>>, vector<16x32xf32>
    %cst = arith.constant dense<0.000000e+00> : vector<16x32xf32>
    %2 = tpu.matmul %0, %1, %cst {dimension_numbers = #tpu.dot_dimension_numbers<[1], [0], [0], [1], [0, 0, 1, 1], [], []>} : vector<16x16xf32>, vector<16x32xf32>, vector<16x32xf32> -> vector<16x32xf32>
    %3 = tpu.concatenate %2, %2 in 1 : vector<16x32xf32>, vector<16x32xf32> -> vector<16x64xf32>
    %c0_3 = arith.constant 0 : index
    %c0_4 = arith.constant 0 : index
    %4 = vector.load %arg3[%c0_3, %c0_4] : memref<16x64xf32, #tpu.memory_space<vmem>>, vector<16x64xf32>
    tpu.vector_store %arg3[%c0_3, %c0_4], %3 {strides = array<i32>} : memref<16x64xf32, #tpu.memory_space<vmem>>, vector<16x64xf32>,
    return
  }
  func.func @transform_0(%arg0: i32) -> (i32, i32) {
    %c0_i32 = arith.constant 0 : i32
    %c0_i32_0 = arith.constant 0 : i32
    return %arg0, %c0_i32 : i32, i32
  }
  func.func @transform_1(%arg0: i32) -> (i32, i32) {
    %c0_i32 = arith.constant 0 : i32
    %c0_i32_0 = arith.constant 0 : i32
    %c0_i32_1 = arith.constant 0 : i32
    return %c0_i32, %c0_i32_0 : i32, i32
  }
  func.func @transform_2(%arg0: i32) -> (i32, i32) {
    %c0_i32 = arith.constant 0 : i32
    %c0_i32_0 = arith.constant 0 : i32
    return %arg0, %c0_i32 : i32, i32
  }
}

</mosaic_0001>

<bundles_post_ra>
// kernel: tpu_custom_call.1
= control target key start
LH: loop header
LB: loop body
LE: loop exit
PB: predicated region body
PF: predicated region fallthrough
CT: control target
= control target key end

     0   :  { %s360_s9 = smov 0   ;;  %s383_s0 = inlined_call_operand.vmem [shape: f32[128,16], index: 0, kind: input, shape index: {}]   ;;  %s384_s1 = inlined_call_operand.vmem [shape: f32[16,32], index: 1, kind: input, shape index: {}]   ;;  %s385_s2 = inlined_call_operand.vmem [shape: f32[128,64], index: 2, kind: output, shape index: {}]  }
   0x1 LB: > { %s303_s10 = sadd.s32 4294967295, %s342_s9   ;;  %p307_p0 = scmp.ge.s32.totalorder %s342_s9, 1  ;;  %s342_s9 = sphi %s360_s9, %s12_s9  }
   0x2   : > { %p113_p1 = scmp.lt.s32.totalorder %s342_s9, 9 }
   0x4   : > { %p114_p2 = pnand %p307_p0, %p113_p1 }
   0x5   : > { %s308_s15 = sshll.u32 (!%p114_p2), %s303_s10, 1  ;;  %s344_s20 = smov (!%p114_p2), 32  }
   0x6   : > { %117 = sbr.rel (%p114_p2) target bundleno = 332 (0x14c), region = 28  ;;  %p136_p3 = scmp.lt.s32.totalorder (!%p114_p2), %s308_s15, 15 }
   0xb   : > { %v150_v0 = vld [vmem:[%s384_s1 + $0x8] sm:$0xff]  ;;  %v149_v1 = vld [vmem:[%s384_s1] sm:$0xff]  ;;  %s387_s15 = smov (!%p136_p3, %s308_s15), 15  ;;  %vm151_vm0 = vcmask 130048   ;;  %vm241_vm1 = vcmask 261120   ;;  %vm244_vm2 = vcmask 523264  }
   0xc   : > { %320 = vmatprep.subr.mxu0 %v150_v0  ;;  %s309_s16 = sshll.u32 %s387_s15, 3 }
   0xd   : > { %321 = vmatpush3.msra.mxu0 %v150_v0  ;;  %s139_s19 = scalar_lea.vmem %s383_s0, %s309_s16  ;;  %s145_s23 = scalar_lea.vmem %s385_s2, %s309_s16 }
   0xe   : > { %322 = vmatprep.subr.mxu0 %v149_v1  ;;  %v147_v2 = vld [vmem:[%s139_s19] sm:$0xff]  ;;  %v148_v3 = vld [vmem:[%s139_s19 + $0x8] sm:$0xff] }
   0xf   : > { %323 = vmatpush3.msra.mxu0 %v149_v1  ;;  %324 = vmatprep.mubr.msk.f32.mxu0 %vm151_vm0, %v147_v2 }
  0x10   : > { %325 = vmatmul.mubr.msk.f32.vlgmr.msra.gmra.mxu0 %vm151_vm0, %v148_v3 }
  0xd0   : > { %v326_v4 = vpop.f32.mrf.mxu0 }
  0xd2   : > { %v224_v5 = vpop.f32.mrf.mxu0 }
  0xd3   : > { %235 = vrot.lane.b32.xlu0 %v224_v5, %s344_s20 }
  0xd7   : > { %237 = vrot.lane.b32.xlu0 %v326_v4, %s344_s20 }
 0x145   : > { %v236_v6 = vpop.permute.xlu0 %235 }
 0x146   : > { %v242_v7 = vsel %vm241_vm1, %v224_v5, %v236_v6 }
 0x147   : > { %245 = vst.msk [vmem:[%s145_s23] sm:$0xff] %vm244_vm2, %v242_v7 }
 0x149   : > { %v238_v8 = vpop.permute.xlu0 %237 }
 0x14a   : > { %v243_v9 = vsel %vm241_vm1, %v326_v4, %v238_v8 }
 0x14b   : > { %246 = vst.msk [vmem:[%s145_s23 + $0x8] sm:$0xff] %vm244_vm2, %v243_v9 }
 0x14c PF: > { %s12_s9 = sadd.s32 1, %s342_s9  }
 0x14d   : > { %p9_p4 = scmp.ge.s32.totalorder %s12_s9, 10  }
 0x14f   :  { %11 = sbr.rel (!%p9_p4) target bundleno = 1 (0x1), region = 58 }

</bundles_post_ra>
